<compile_context>
chip_gen: v7x
topology: tpu7x:2x2x1
jax: 0.10.0
libtpu: 0.0.40
codegen_flags: <defaults>
</compile_context>

<pallas_src>
import numpy as np
import jax
import jax.numpy as jnp
from jax.experimental import pallas as pl
from jax.experimental.pallas import tpu as pltpu


def _round_up(x, m):
    return (x + m - 1) // m * m


def _rnn_recurrence_kernel(p_ref, whh_ref, out_ref, h_scratch):
    # p_ref:     (Tb, Bt, Hp) f32  -- precomputed x @ W_ih^T + (b_ih + b_hh), this block
    # whh_ref:   (Hp, Hp)     bf16 -- W_hh^T (resident across the whole grid)
    # out_ref:   (Tb, Bt, Hp) f32  -- hidden states for this block
    # h_scratch: (Bt, Hp)     f32  -- hidden state carried across the (sequential) time axis
    t = pl.program_id(1)

    @pl.when(t == 0)
    def _():
        h_scratch[...] = jnp.zeros_like(h_scratch)

    whh = whh_ref[...]            # hoisted: loaded once per grid step, not per timestep
    tb = p_ref.shape[0]

    def step(i, h_prev):
        # Only the recurrent matmul sits on the serialized critical path.
        pre = p_ref[i] + jnp.dot(h_prev.astype(jnp.bfloat16), whh,
                                 preferred_element_type=jnp.float32)
        h_new = jnp.tanh(pre)
        out_ref[i] = h_new
        return h_new

    h_final = jax.lax.fori_loop(0, tb, step, h_scratch[...], unroll=True)
    h_scratch[...] = h_final


def rnn_forward_pallas(p_tm, w_hh_t_pad, *, batch_tile, time_block):
    """Run the recurrence over precomputed projections.

    p_tm:      (Tp, Bp, Hp) f32 time-major, already padded
    w_hh_t_pad:(Hp, Hp) bf16  (W_hh transposed, zero padded)
    Returns (Tp, Bp, Hp) f32 hidden states.
    """
    Tp, Bp, Hp = p_tm.shape
    Tb, Bt = time_block, batch_tile
    grid = (Bp // Bt, Tp // Tb)

    return pl.pallas_call(
        _rnn_recurrence_kernel,
        out_shape=jax.ShapeDtypeStruct((Tp, Bp, Hp), jnp.float32),
        grid=grid,
        in_specs=[
            pl.BlockSpec((Tb, Bt, Hp), lambda b, t: (t, b, 0)),
            pl.BlockSpec((Hp, Hp), lambda b, t: (0, 0)),
        ],
        out_specs=pl.BlockSpec((Tb, Bt, Hp), lambda b, t: (t, b, 0)),
        scratch_shapes=[pltpu.VMEM((Bt, Hp), jnp.float32)],
        compiler_params=pltpu.CompilerParams(
            # batch tiles are independent -> "parallel" (v7x megacore);
            # the recurrence over time must stay "arbitrary".
            dimension_semantics=("parallel", "arbitrary"),
            vmem_limit_bytes=48 * 1024 * 1024,
        ),
    )(p_tm, w_hh_t_pad)


def rnn_encoder_forward(x_btd, lengths, w_ih, w_hh, b_ih, b_hh,
                        *, time_block=8, batch_tile=None):
    """Equivalent of RNNEncoder.forward on a 'packed' batch.

    x_btd:   (B, T, D_in) padded batch-first inputs
    lengths: python list of valid lengths per sequence (len B)
    Returns: (sum(lengths), H) -- valid timesteps concatenated in batch order,
             matching pad_packed_sequence + the fancy-index gather in the module.
    """
    B, T, D_in = x_btd.shape
    H = w_ih.shape[0]

    Hp = _round_up(H, 128)              # lane-dense output / full MXU lanes
    Bp = _round_up(B, 8)                # full sublanes
    Tb = min(time_block, _round_up(T, 8))
    Tp = _round_up(T, Tb)
    if batch_tile is None:
        batch_tile = min(Bp, 128)
    Bt = batch_tile
    Bp = _round_up(Bp, Bt)

    # --- Hoisted input projection + bias: one big, well-shaped matmul (no serial dep). ---
    bias = (b_ih + b_hh).astype(jnp.float32)
    p_tm = jnp.einsum("btd,hd->tbh",
                      x_btd.astype(jnp.float32),
                      w_ih.astype(jnp.float32)) + bias          # (T, B, H), time-major
    p_tm = jnp.pad(p_tm, ((0, Tp - T), (0, Bp - B), (0, Hp - H)))

    # Resident recurrent weight, transposed + zero padded, bf16 (f32 accumulation in-kernel).
    whh_t = jnp.pad(w_hh.astype(jnp.float32).T,
                    ((0, Hp - H), (0, Hp - H))).astype(jnp.bfloat16)   # (Hp, Hp)

    out_tm = rnn_forward_pallas(p_tm, whh_t, batch_tile=Bt, time_block=Tb)  # (Tp, Bp, Hp)

    # --- Gather valid timesteps (pad_packed_sequence + fancy-index semantics). ---
    # Indexed directly in the time-major layout, so no output transpose is needed.
    ii = np.concatenate([np.arange(l) * Bp + i for i, l in enumerate(lengths)])
    out_flat = out_tm.reshape(-1, Hp)                 # (Tp*Bp, Hp)
    return out_flat[jnp.asarray(ii), :H]              # (sum(lengths), H)


def _reference_rnn(x_btd, lengths, w_ih, w_hh, b_ih, b_hh):
    """Pure-JAX f32 reference (lax.scan), faithful to nn.RNN + the module's gather."""
    B, T, D = x_btd.shape
    H = w_ih.shape[0]

    def step(h, x_t):
        h_new = jnp.tanh(x_t @ w_ih.T + h @ w_hh.T + b_ih + b_hh)
        return h_new, h_new

    x_tm = jnp.transpose(x_btd, (1, 0, 2))
    _, hs = jax.lax.scan(step, jnp.zeros((B, H), jnp.float32), x_tm)
    enc = jnp.transpose(hs, (1, 0, 2)).reshape(-1, H)
    max_length = max(lengths)
    ii = np.concatenate([i * max_length + np.arange(l) for i, l in enumerate(lengths)])
    return enc[jnp.asarray(ii)]


if __name__ == "__main__":
    # Small shapes consistent with the module: batch=2, seq=8, input_size=16, hidden=64
    # (nn.RNN default output_size=64 in RNNEncoder).
    B, T, D_in, H = 2, 8, 16, 64
    key = jax.random.PRNGKey(0)
    k_x, k_wih, k_whh, k_bih, k_bhh = jax.random.split(key, 5)

    # nn.RNN-style init: U(-1/sqrt(H), 1/sqrt(H)).
    bound = 1.0 / np.sqrt(H)
    w_ih = jax.random.uniform(k_wih, (H, D_in), jnp.float32, -bound, bound)
    w_hh = jax.random.uniform(k_whh, (H, H), jnp.float32, -bound, bound)
    b_ih = jax.random.uniform(k_bih, (H,), jnp.float32, -bound, bound)
    b_hh = jax.random.uniform(k_bhh, (H,), jnp.float32, -bound, bound)

    # Padded batch-first inputs + per-sequence lengths (the PackedSequence equivalent).
    x = jax.random.normal(k_x, (B, T, D_in), jnp.float32)
    lengths = [8, 5]

    out = rnn_encoder_forward(x, lengths, w_ih, w_hh, b_ih, b_hh)
    out = jax.block_until_ready(out)

    ref = _reference_rnn(x, lengths, w_ih, w_hh, b_ih, b_hh)
    # bf16 recurrent matmul (f32 accumulation) vs pure-f32 reference -> bf16-level tolerance.
    np.testing.assert_allclose(np.asarray(out), np.asarray(ref), rtol=2e-2, atol=2e-2)
    assert out.shape == (sum(lengths), H)

    print("KERNEL_OK")
</pallas_src>

<mosaic_0001>
module attributes {stable_mosaic.version = 11 : i64} {
  func.func @_rnn_recurrence_kernel(%arg0: i32, %arg1: i32, %arg2: memref<8x8x128xf32, #tpu.memory_space<vmem>>, %arg3: memref<128x128xbf16, #tpu.memory_space<vmem>>, %arg4: memref<8x8x128xf32, #tpu.memory_space<vmem>>, %arg5: memref<8x128xf32, #tpu.memory_space<vmem>>) attributes {dimension_semantics = [#tpu.dimension_semantics<parallel>, #tpu.dimension_semantics<arbitrary>], iteration_bounds = array<i64: 1, 1>, scalar_prefetch = 0 : i64, scratch_operands = 1 : i64, tpu.core_type = #tpu.core_type<tc>, window_params = [{transform_indices = @transform_0, window_bounds = array<i64: 8, 8, 128>}, {pipeline_mode = #tpu.pipeline_mode<synchronous>, transform_indices = @transform_1, window_bounds = array<i64: 128, 128>}, {transform_indices = @transform_2, window_bounds = array<i64: 8, 8, 128>}]} {
    %c0_i32 = arith.constant 0 : i32
    %0 = arith.cmpi eq, %arg1, %c0_i32 : i32
    %1 = arith.extui %0 : i1 to i32
    %c0_i32_0 = arith.constant 0 : i32
    %2 = arith.cmpi ne, %1, %c0_i32_0 : i32
    scf.if %2 {
      %cst_46 = arith.constant 0.000000e+00 : f32
      %94 = vector.broadcast %cst_46 : f32 to vector<8x128xf32>
      %c0_47 = arith.constant 0 : index
      %c0_48 = arith.constant 0 : index
      %95 = vector.load %arg5[%c0_47, %c0_48] : memref<8x128xf32, #tpu.memory_space<vmem>>, vector<8x128xf32>
      tpu.vector_store %arg5[%c0_47, %c0_48], %94 {strides = array<i32>} : memref<8x128xf32, #tpu.memory_space<vmem>>, vector<8x128xf32>,
    } else {
    }
    %c0 = arith.constant 0 : index
    %c0_1 = arith.constant 0 : index
    %3 = vector.load %arg3[%c0, %c0_1] : memref<128x128xbf16, #tpu.memory_space<vmem>>, vector<128x128xbf16>
    %c0_2 = arith.constant 0 : index
    %c0_3 = arith.constant 0 : index
    %4 = vector.load %arg5[%c0_2, %c0_3] : memref<8x128xf32, #tpu.memory_space<vmem>>, vector<8x128xf32>
    %c0_i32_4 = arith.constant 0 : i32
    %5 = arith.index_cast %c0_i32_4 : i32 to index
    %c0_5 = arith.constant 0 : index
    %c0_6 = arith.constant 0 : index
    %6 = vector.load %arg2[%5, %c0_5, %c0_6] : memref<8x8x128xf32, #tpu.memory_space<vmem>>, vector<1x8x128xf32>
    %7 = vector.shape_cast %6 : vector<1x8x128xf32> to vector<8x128xf32>
    %8 = arith.truncf %4 : vector<8x128xf32> to vector<8x128xbf16>
    %cst = arith.constant dense<0.000000e+00> : vector<8x128xf32>
    %9 = tpu.matmul %8, %3, %cst {dimension_numbers = #tpu.dot_dimension_numbers<[1], [0], [0], [1], [0, 0, 1, 1], [], []>} : vector<8x128xbf16>, vector<128x128xbf16>, vector<8x128xf32> -> vector<8x128xf32>
    %10 = arith.addf %7, %9 : vector<8x128xf32>
    %11 = math.tanh %10 : vector<8x128xf32>
    %12 = arith.index_cast %c0_i32_4 : i32 to index
    %c0_7 = arith.constant 0 : index
    %c0_8 = arith.constant 0 : index
    %13 = vector.load %arg4[%12, %c0_7, %c0_8] : memref<8x8x128xf32, #tpu.memory_space<vmem>>, vector<1x8x128xf32>
    %14 = vector.shape_cast %13 : vector<1x8x128xf32> to vector<8x128xf32>
    %15 = vector.shape_cast %11 : vector<8x128xf32> to vector<1x8x128xf32>
    tpu.vector_store %arg4[%12, %c0_7, %c0_8], %15 {strides = array<i32>} : memref<8x8x128xf32, #tpu.memory_space<vmem>>, vector<1x8x128xf32>,
    %c1_i32 = arith.constant 1 : i32
    %16 = arith.index_cast %c1_i32 : i32 to index
    %c0_9 = arith.constant 0 : index
    %c0_10 = arith.constant 0 : index
    %17 = vector.load %arg2[%16, %c0_9, %c0_10] : memref<8x8x128xf32, #tpu.memory_space<vmem>>, vector<1x8x128xf32>
    %18 = vector.shape_cast %17 : vector<1x8x128xf32> to vector<8x128xf32>
    %19 = arith.truncf %11 : vector<8x128xf32> to vector<8x128xbf16>
    %cst_11 = arith.constant dense<0.000000e+00> : vector<8x128xf32>
    %20 = tpu.matmul %19, %3, %cst_11 {dimension_numbers = #tpu.dot_dimension_numbers<[1], [0], [0], [1], [0, 0, 1, 1], [], []>} : vector<8x128xbf16>, vector<128x128xbf16>, vector<8x128xf32> -> vector<8x128xf32>
    %21 = arith.addf %18, %20 : vector<8x128xf32>
    %22 = math.tanh %21 : vector<8x128xf32>
    %23 = arith.index_cast %c1_i32 : i32 to index
    %c0_12 = arith.constant 0 : index
    %c0_13 = arith.constant 0 : index
    %24 = vector.load %arg4[%23, %c0_12, %c0_13] : memref<8x8x128xf32, #tpu.memory_space<vmem>>, vector<1x8x128xf32>
    %25 = vector.shape_cast %24 : vector<1x8x128xf32> to vector<8x128xf32>
    %26 = vector.shape_cast %22 : vector<8x128xf32> to vector<1x8x128xf32>
    tpu.vector_store %arg4[%23, %c0_12, %c0_13], %26 {strides = array<i32>} : memref<8x8x128xf32, #tpu.memory_space<vmem>>, vector<1x8x128xf32>,
    %c2_i32 = arith.constant 2 : i32
    %27 = arith.index_cast %c2_i32 : i32 to index
    %c0_14 = arith.constant 0 : index
    %c0_15 = arith.constant 0 : index
    %28 = vector.load %arg2[%27, %c0_14, %c0_15] : memref<8x8x128xf32, #tpu.memory_space<vmem>>, vector<1x8x128xf32>
    %29 = vector.shape_cast %28 : vector<1x8x128xf32> to vector<8x128xf32>
    %30 = arith.truncf %22 : vector<8x128xf32> to vector<8x128xbf16>
    %cst_16 = arith.constant dense<0.000000e+00> : vector<8x128xf32>
    %31 = tpu.matmul %30, %3, %cst_16 {dimension_numbers = #tpu.dot_dimension_numbers<[1], [0], [0], [1], [0, 0, 1, 1], [], []>} : vector<8x128xbf16>, vector<128x128xbf16>, vector<8x128xf32> -> vector<8x128xf32>
    %32 = arith.addf %29, %31 : vector<8x128xf32>
    %33 = math.tanh %32 : vector<8x128xf32>
    %34 = arith.index_cast %c2_i32 : i32 to index
    %c0_17 = arith.constant 0 : index
    %c0_18 = arith.constant 0 : index
    %35 = vector.load %arg4[%34, %c0_17, %c0_18] : memref<8x8x128xf32, #tpu.memory_space<vmem>>, vector<1x8x128xf32>
    %36 = vector.shape_cast %35 : vector<1x8x128xf32> to vector<8x128xf32>
    %37 = vector.shape_cast %33 : vector<8x128xf32> to vector<1x8x128xf32>
    tpu.vector_store %arg4[%34, %c0_17, %c0_18], %37 {strides = array<i32>} : memref<8x8x128xf32, #tpu.memory_space<vmem>>, vector<1x8x128xf32>,
    %c3_i32 = arith.constant 3 : i32
    %38 = arith.index_cast %c3_i32 : i32 to index
    %c0_19 = arith.constant 0 : index
    %c0_20 = arith.constant 0 : index
    %39 = vector.load %arg2[%38, %c0_19, %c0_20] : memref<8x8x128xf32, #tpu.memory_space<vmem>>, vector<1x8x128xf32>
    %40 = vector.shape_cast %39 : vector<1x8x128xf32> to vector<8x128xf32>
    %41 = arith.truncf %33 : vector<8x128xf32> to vector<8x128xbf16>
    %cst_21 = arith.constant dense<0.000000e+00> : vector<8x128xf32>
    %42 = tpu.matmul %41, %3, %cst_21 {dimension_numbers = #tpu.dot_dimension_numbers<[1], [0], [0], [1], [0, 0, 1, 1], [], []>} : vector<8x128xbf16>, vector<128x128xbf16>, vector<8x128xf32> -> vector<8x128xf32>
    %43 = arith.addf %40, %42 : vector<8x128xf32>
    %44 = math.tanh %43 : vector<8x128xf32>
    %45 = arith.index_cast %c3_i32 : i32 to index
    %c0_22 = arith.constant 0 : index
    %c0_23 = arith.constant 0 : index
    %46 = vector.load %arg4[%45, %c0_22, %c0_23] : memref<8x8x128xf32, #tpu.memory_space<vmem>>, vector<1x8x128xf32>
    %47 = vector.shape_cast %46 : vector<1x8x128xf32> to vector<8x128xf32>
    %48 = vector.shape_cast %44 : vector<8x128xf32> to vector<1x8x128xf32>
    tpu.vector_store %arg4[%45, %c0_22, %c0_23], %48 {strides = array<i32>} : memref<8x8x128xf32, #tpu.memory_space<vmem>>, vector<1x8x128xf32>,
    %c4_i32 = arith.constant 4 : i32
    %49 = arith.index_cast %c4_i32 : i32 to index
    %c0_24 = arith.constant 0 : index
    %c0_25 = arith.constant 0 : index
    %50 = vector.load %arg2[%49, %c0_24, %c0_25] : memref<8x8x128xf32, #tpu.memory_space<vmem>>, vector<1x8x128xf32>
    %51 = vector.shape_cast %50 : vector<1x8x128xf32> to vector<8x128xf32>
    %52 = arith.truncf %44 : vector<8x128xf32> to vector<8x128xbf16>
    %cst_26 = arith.constant dense<0.000000e+00> : vector<8x128xf32>
    %53 = tpu.matmul %52, %3, %cst_26 {dimension_numbers = #tpu.dot_dimension_numbers<[1], [0], [0], [1], [0, 0, 1, 1], [], []>} : vector<8x128xbf16>, vector<128x128xbf16>, vector<8x128xf32> -> vector<8x128xf32>
    %54 = arith.addf %51, %53 : vector<8x128xf32>
    %55 = math.tanh %54 : vector<8x128xf32>
    %56 = arith.index_cast %c4_i32 : i32 to index
    %c0_27 = arith.constant 0 : index
    %c0_28 = arith.constant 0 : index
    %57 = vector.load %arg4[%56, %c0_27, %c0_28] : memref<8x8x128xf32, #tpu.memory_space<vmem>>, vector<1x8x128xf32>
    %58 = vector.shape_cast %57 : vector<1x8x128xf32> to vector<8x128xf32>
    %59 = vector.shape_cast %55 : vector<8x128xf32> to vector<1x8x128xf32>
    tpu.vector_store %arg4[%56, %c0_27, %c0_28], %59 {strides = array<i32>} : memref<8x8x128xf32, #tpu.memory_space<vmem>>, vector<1x8x128xf32>,
    %c5_i32 = arith.constant 5 : i32
    %60 = arith.index_cast %c5_i32 : i32 to index
    %c0_29 = arith.constant 0 : index
    %c0_30 = arith.constant 0 : index
    %61 = vector.load %arg2[%60, %c0_29, %c0_30] : memref<8x8x128xf32, #tpu.memory_space<vmem>>, vector<1x8x128xf32>
    %62 = vector.shape_cast %61 : vector<1x8x128xf32> to vector<8x128xf32>
    %63 = arith.truncf %55 : vector<8x128xf32> to vector<8x128xbf16>
    %cst_31 = arith.constant dense<0.000000e+00> : vector<8x128xf32>
    %64 = tpu.matmul %63, %3, %cst_31 {dimension_numbers = #tpu.dot_dimension_numbers<[1], [0], [0], [1], [0, 0, 1, 1], [], []>} : vector<8x128xbf16>, vector<128x128xbf16>, vector<8x128xf32> -> vector<8x128xf32>
    %65 = arith.addf %62, %64 : vector<8x128xf32>
    %66 = math.tanh %65 : vector<8x128xf32>
    %67 = arith.index_cast %c5_i32 : i32 to index
    %c0_32 = arith.constant 0 : index
    %c0_33 = arith.constant 0 : index
    %68 = vector.load %arg4[%67, %c0_32, %c0_33] : memref<8x8x128xf32, #tpu.memory_space<vmem>>, vector<1x8x128xf32>
    %69 = vector.shape_cast %68 : vector<1x8x128xf32> to vector<8x128xf32>
    %70 = vector.shape_cast %66 : vector<8x128xf32> to vector<1x8x128xf32>
    tpu.vector_store %arg4[%67, %c0_32, %c0_33], %70 {strides = array<i32>} : memref<8x8x128xf32, #tpu.memory_space<vmem>>, vector<1x8x128xf32>,
    %c6_i32 = arith.constant 6 : i32
    %71 = arith.index_cast %c6_i32 : i32 to index
    %c0_34 = arith.constant 0 : index
    %c0_35 = arith.constant 0 : index
    %72 = vector.load %arg2[%71, %c0_34, %c0_35] : memref<8x8x128xf32, #tpu.memory_space<vmem>>, vector<1x8x128xf32>
    %73 = vector.shape_cast %72 : vector<1x8x128xf32> to vector<8x128xf32>
    %74 = arith.truncf %66 : vector<8x128xf32> to vector<8x128xbf16>
    %cst_36 = arith.constant dense<0.000000e+00> : vector<8x128xf32>
    %75 = tpu.matmul %74, %3, %cst_36 {dimension_numbers = #tpu.dot_dimension_numbers<[1], [0], [0], [1], [0, 0, 1, 1], [], []>} : vector<8x128xbf16>, vector<128x128xbf16>, vector<8x128xf32> -> vector<8x128xf32>
    %76 = arith.addf %73, %75 : vector<8x128xf32>
    %77 = math.tanh %76 : vector<8x128xf32>
    %78 = arith.index_cast %c6_i32 : i32 to index
    %c0_37 = arith.constant 0 : index
    %c0_38 = arith.constant 0 : index
    %79 = vector.load %arg4[%78, %c0_37, %c0_38] : memref<8x8x128xf32, #tpu.memory_space<vmem>>, vector<1x8x128xf32>
    %80 = vector.shape_cast %79 : vector<1x8x128xf32> to vector<8x128xf32>
    %81 = vector.shape_cast %77 : vector<8x128xf32> to vector<1x8x128xf32>
    tpu.vector_store %arg4[%78, %c0_37, %c0_38], %81 {strides = array<i32>} : memref<8x8x128xf32, #tpu.memory_space<vmem>>, vector<1x8x128xf32>,
    %c7_i32 = arith.constant 7 : i32
    %82 = arith.index_cast %c7_i32 : i32 to index
    %c0_39 = arith.constant 0 : index
    %c0_40 = arith.constant 0 : index
    %83 = vector.load %arg2[%82, %c0_39, %c0_40] : memref<8x8x128xf32, #tpu.memory_space<vmem>>, vector<1x8x128xf32>
    %84 = vector.shape_cast %83 : vector<1x8x128xf32> to vector<8x128xf32>
    %85 = arith.truncf %77 : vector<8x128xf32> to vector<8x128xbf16>
    %cst_41 = arith.constant dense<0.000000e+00> : vector<8x128xf32>
    %86 = tpu.matmul %85, %3, %cst_41 {dimension_numbers = #tpu.dot_dimension_numbers<[1], [0], [0], [1], [0, 0, 1, 1], [], []>} : vector<8x128xbf16>, vector<128x128xbf16>, vector<8x128xf32> -> vector<8x128xf32>
    %87 = arith.addf %84, %86 : vector<8x128xf32>
    %88 = math.tanh %87 : vector<8x128xf32>
    %89 = arith.index_cast %c7_i32 : i32 to index
    %c0_42 = arith.constant 0 : index
    %c0_43 = arith.constant 0 : index
    %90 = vector.load %arg4[%89, %c0_42, %c0_43] : memref<8x8x128xf32, #tpu.memory_space<vmem>>, vector<1x8x128xf32>
    %91 = vector.shape_cast %90 : vector<1x8x128xf32> to vector<8x128xf32>
    %92 = vector.shape_cast %88 : vector<8x128xf32> to vector<1x8x128xf32>
    tpu.vector_store %arg4[%89, %c0_42, %c0_43], %92 {strides = array<i32>} : memref<8x8x128xf32, #tpu.memory_space<vmem>>, vector<1x8x128xf32>,
    %c8_i32 = arith.constant 8 : i32
    %c0_44 = arith.constant 0 : index
    %c0_45 = arith.constant 0 : index
    %93 = vector.load %arg5[%c0_44, %c0_45] : memref<8x128xf32, #tpu.memory_space<vmem>>, vector<8x128xf32>
    tpu.vector_store %arg5[%c0_44, %c0_45], %88 {strides = array<i32>} : memref<8x128xf32, #tpu.memory_space<vmem>>, vector<8x128xf32>,
    return
  }
  func.func @transform_0(%arg0: i32, %arg1: i32) -> (i32, i32, i32) {
    %c0_i32 = arith.constant 0 : i32
    %c0_i32_0 = arith.constant 0 : i32
    return %arg1, %arg0, %c0_i32 : i32, i32, i32
  }
  func.func @transform_1(%arg0: i32, %arg1: i32) -> (i32, i32) {
    %c0_i32 = arith.constant 0 : i32
    %c0_i32_0 = arith.constant 0 : i32
    %c0_i32_1 = arith.constant 0 : i32
    return %c0_i32, %c0_i32_0 : i32, i32
  }
  func.func @transform_2(%arg0: i32, %arg1: i32) -> (i32, i32, i32) {
    %c0_i32 = arith.constant 0 : i32
    %c0_i32_0 = arith.constant 0 : i32
    return %arg1, %arg0, %c0_i32 : i32, i32, i32
  }
}

</mosaic_0001>

<bundles_post_ra>
// kernel: tpu_custom_call.1
= control target key start
LH: loop header
LB: loop body
LE: loop exit
PB: predicated region body
PF: predicated region fallthrough
CT: control target
= control target key end

     0   :  { %7 = vsyncpa [#allocation4], 0  ;;  %s1077_s0 = inlined_call_operand.hbm [shape: f32[8,8,128], index: 0, kind: input, shape index: {}]   ;;  %s1078_s1 = inlined_call_operand.hbm [shape: bf16[128,128], index: 1, kind: input, shape index: {}]   ;;  %s1079_s2 = inlined_call_operand.hbm [shape: f32[8,8,128], index: 2, kind: output, shape index: {}]  }
   0x1   :  { %8 = vsyncpa [#allocation7], 0 }
   0x2   :  { %9 = vsyncpa [#allocation5], 0  ;;  %s850_s9 = smov [#allocation3]   ;;  %s778_s13 = scalar_lea.hbm %s1077_s0, 1024 }
   0x3   :  { %s15_s10 = sshll.u32 %s850_s9, 4  ;;  %p779_p0 = scmp.ne.s32.totalorder %s1077_s0, %s778_s13  ;;  %s16_s10 = int_to_ptr.vmem [resolvable:$true] %s15_s10 }
   0x4   :  { %p782_p1 = scmp.lt.u32.totalorder %s778_s13, %s1077_s0 }
   0x6   :  { %p784_p2 = pnand %p782_p1, %p779_p0 }
   0x8   :  { %787 = shalt.err (!%p784_p2)
}
   0x9   :  { %s788_s18 = scalar_lea.vmem %s16_s10, 1024  ;;  %p793_p4 = scmp.lt.s32.totalorder %s16_s10, %s16_s10 }
   0xa   :  { %p789_p3 = scmp.ne.s32.totalorder %s16_s10, %s788_s18  ;;  %p794_p5 = scmp.lt.s32.totalorder %s788_s18, %s788_s18 }
   0xc   :  { %p795_p6 = por %p794_p5, %p793_p4 }
   0xe   :  { %p796_p7 = pnand %p795_p6, %p789_p3 }
  0x10   :  { %799 = shalt.err (!%p796_p7)
}
  0x11   :  { %s851_s19 = smov 128   ;;  %s852_s20 = smov 8  }
  0x12   :  { %21 = dma.hbm_to_vmem [thread:$0]  %s1077_s0, 1024, %s16_s10, [#allocation4], %s851_s19, %s851_s19, %s852_s20  }
  0x13   :  { %s853_s23 = smov [#allocation6]   ;;  %s800_s27 = scalar_lea.hbm %s1078_s1, 1024 }
  0x14   :  { %s27_s24 = sshll.u32 %s853_s23, 4  ;;  %p801_p8 = scmp.ne.s32.totalorder %s1078_s1, %s800_s27  ;;  %s28_s24 = int_to_ptr.vmem [resolvable:$true] %s27_s24 }
  0x15   :  { %p804_p9 = scmp.lt.u32.totalorder %s800_s27, %s1078_s1 }
  0x17   :  { %p806_p10 = pnand %p804_p9, %p801_p8 }
  0x19   :  { %809 = shalt.err (!%p806_p10)
}
  0x1a   :  { %s810_s4 = scalar_lea.vmem %s28_s24, 1024  ;;  %p815_p12 = scmp.lt.s32.totalorder %s28_s24, %s28_s24 }
  0x1b   :  { %p811_p11 = scmp.ne.s32.totalorder %s28_s24, %s810_s4  ;;  %p816_p13 = scmp.lt.s32.totalorder %s810_s4, %s810_s4 }
  0x1d   :  { %p817_p0 = por %p816_p13, %p815_p12 }
  0x1f   :  { %p818_p1 = pnand %p817_p0, %p811_p11 }
  0x21   :  { %821 = shalt.err (!%p818_p1)
}
  0x22   :  { %s854_s0 = smov 64   ;;  %s855_s5 = smov 4  }
  0x23   :  { %33 = dma.hbm_to_vmem [thread:$0]  %s1078_s1, 1024, %s28_s24, [#allocation7], %s854_s0, %s854_s0, %s855_s5  }
  0x24   :  { %844 = dma.done.wait [#allocation4], 1024  }
  0x25   :  { %845 = vsyncadd [#allocation4], 4294966272 }
  0x26   :  { %846 = dma.done.wait [#allocation7], 1024  }
  0x27   :  { %847 = vsyncadd [#allocation7], 4294966272  ;;  %v856_v0 = vmov 0.0   ;;  %vm857_vm0 = vmmov 0   ;;  %v908_v1 = vld [vmem:[#allocation6] sm:$0xff]   ;;  %v911_v2 = vld [vmem:[#allocation6 + $0x8] sm:$0xff]  }
  0x28   :  { %584 = vmatprep.subr.bf16.mxu0 %v856_v0  ;;  %600 = vmatprep.mubr.msk.bf16.mxu0 %vm857_vm0, %v856_v0  ;;  %v917_v3 = vld [vmem:[#allocation6 + $0x10] sm:$0xff]   ;;  %v923_v4 = vld [vmem:[#allocation6 + $0x18] sm:$0xff]   ;;  %v929_v5 = vld [vmem:[#allocation6 + $0x20] sm:$0xff]   ;;  %v858_v9 = vmov 0.0|0.0   ;;  %s859_s1 = smov [#allocation8]  }
  0x29   :  { %604 = vmatprep.subr.bf16.mxu1 %v856_v0  ;;  %620 = vmatprep.mubr.msk.bf16.mxu1 %vm857_vm0, %v856_v0  ;;  %v935_v6 = vld [vmem:[#allocation6 + $0x28] sm:$0xff]   ;;  %v941_v7 = vld [vmem:[#allocation6 + $0x30] sm:$0xff]   ;;  %v947_v8 = vld [vmem:[#allocation6 + $0x38] sm:$0xff]   ;;  %s491_s8 = sshll.u32 %s859_s1, 4  ;;  %s492_s8 = int_to_ptr.vmem [resolvable:$true] %s491_s8 }
  0x2a   :  { %585 = vmatpush3.bf16.msra.mxu0 %v908_v1  ;;  %605 = vmatpush3.bf16.msra.mxu1 %v908_v1  ;;  %v63_v10 = vld [vmem:[#allocation3] sm:$0xff]  ;;  %v157_v18 = vld [vmem:[#allocation3 + $0x8] sm:$0xff]  ;;  %v204_v26 = vld [vmem:[#allocation3 + $0x10] sm:$0xff]  ;;  %s822_s9 = scalar_lea.vmem %s492_s8, 1024  ;;  %p827_p3 = scmp.lt.s32.totalorder %s492_s8, %s492_s8 }
  0x2b   :  { %586 = vmatprep.subr.bf16.mxu0 %v856_v0  ;;  %606 = vmatprep.subr.bf16.mxu1 %v856_v0  ;;  %v251_v34 = vld [vmem:[#allocation3 + $0x18] sm:$0xff]  ;;  %v298_v42 = vld [vmem:[#allocation3 + $0x20] sm:$0xff]  ;;  %v345_v50 = vld [vmem:[#allocation3 + $0x28] sm:$0xff]  ;;  %p823_p2 = scmp.ne.s32.totalorder %s492_s8, %s822_s9  ;;  %p828_p4 = scmp.lt.s32.totalorder %s822_s9, %s822_s9 }
  0x2c   :  { %v392_v58 = vld [vmem:[#allocation3 + $0x30] sm:$0xff] }
  0x2d   :  { %p829_p5 = por %p828_p4, %p827_p3 }
  0x2e   :  { %587 = vmatpush3.bf16.msra.mxu0 %v911_v2  ;;  %607 = vmatpush3.bf16.msra.mxu1 %v911_v2 }
  0x2f   :  { %588 = vmatprep.subr.bf16.mxu0 %v856_v0  ;;  %608 = vmatprep.subr.bf16.mxu1 %v856_v0  ;;  %p830_p6 = pnand %p829_p5, %p823_p2 }
  0x32   :  { %589 = vmatpush3.bf16.msra.mxu0 %v917_v3  ;;  %609 = vmatpush3.bf16.msra.mxu1 %v917_v3 }
  0x33   :  { %590 = vmatprep.subr.bf16.mxu0 %v856_v0  ;;  %610 = vmatprep.subr.bf16.mxu1 %v856_v0 }
  0x36   :  { %591 = vmatpush3.bf16.msra.mxu0 %v923_v4  ;;  %611 = vmatpush3.bf16.msra.mxu1 %v923_v4 }
  0x37   :  { %592 = vmatprep.subr.bf16.mxu0 %v856_v0  ;;  %612 = vmatprep.subr.bf16.mxu1 %v856_v0 }
  0x3a   :  { %593 = vmatpush3.bf16.msra.mxu0 %v929_v5  ;;  %613 = vmatpush3.bf16.msra.mxu1 %v929_v5 }
  0x3b   :  { %594 = vmatprep.subr.bf16.mxu0 %v856_v0  ;;  %614 = vmatprep.subr.bf16.mxu1 %v856_v0 }
  0x3e   :  { %595 = vmatpush3.bf16.msra.mxu0 %v935_v6  ;;  %615 = vmatpush3.bf16.msra.mxu1 %v935_v6 }
  0x3f   :  { %596 = vmatprep.subr.bf16.mxu0 %v856_v0  ;;  %616 = vmatprep.subr.bf16.mxu1 %v856_v0 }
  0x42   :  { %597 = vmatpush3.bf16.msra.mxu0 %v941_v7  ;;  %617 = vmatpush3.bf16.msra.mxu1 %v941_v7 }
  0x43   :  { %598 = vmatprep.subr.bf16.mxu0 %v856_v0  ;;  %618 = vmatprep.subr.bf16.mxu1 %v856_v0 }
  0x46   :  { %599 = vmatpush3.bf16.msra.mxu0 %v947_v8  ;;  %619 = vmatpush3.bf16.msra.mxu1 %v947_v8 }
  0x47   :  { %624 = vmatprep.subr.bf16.mxu0 %v856_v0  ;;  %644 = vmatprep.subr.bf16.mxu1 %v856_v0 }
  0x49   :  { %601 = vmatmul.mubr.bf16.vlgmr.msra.gmra.mrb[0].mxu0 %v858_v9 }
  0x4a   :  { %625 = vmatpush3.bf16.msra.mxu0 %v908_v1  ;;  %640 = vmatprep.mubr.msk.bf16.mxu0 %vm857_vm0, %v856_v0 }
  0x4b   :  { %626 = vmatprep.subr.bf16.mxu0 %v856_v0 }
  0x4e   :  { %627 = vmatpush3.bf16.msra.mxu0 %v911_v2 }
  0x4f   :  { %628 = vmatprep.subr.bf16.mxu0 %v856_v0 }
  0x52   :  { %629 = vmatpush3.bf16.msra.mxu0 %v917_v3 }
  0x53   :  { %630 = vmatprep.subr.bf16.mxu0 %v856_v0 }
  0x56   :  { %631 = vmatpush3.bf16.msra.mxu0 %v923_v4 }
  0x57   :  { %632 = vmatprep.subr.bf16.mxu0 %v856_v0 }
  0x5a   :  { %633 = vmatpush3.bf16.msra.mxu0 %v929_v5 }
  0x5b   :  { %634 = vmatprep.subr.bf16.mxu0 %v856_v0 }
  0x5e   :  { %635 = vmatpush3.bf16.msra.mxu0 %v935_v6 }
  0x5f   :  { %636 = vmatprep.subr.bf16.mxu0 %v856_v0 }
  0x62   :  { %637 = vmatpush3.bf16.msra.mxu0 %v941_v7 }
  0x63   :  { %638 = vmatprep.subr.bf16.mxu0 %v856_v0 }
  0x66   :  { %639 = vmatpush3.bf16.msra.mxu0 %v947_v8 }
  0x67   :  { %664 = vmatprep.subr.bf16.mxu0 %v856_v0 }
 0x11c   :  { %v147_v11 = vpop.f32.mrb[0].mxu0 }
 0x11d   :  { %v153_v12 = vadd.f32 %v147_v11, %v63_v10  ;;  %v602_v13 = vpop.f32.mrb[1].mxu0 }
 0x11e   :  { %v150_v14 = vpop.f32.mrb[2].mxu0 }
 0x11f   :  { %762 = vtanh.f32 %v153_v12  ;;  %v603_v15 = vpop.f32.mrb[3].mxu0 }
 0x129   :  { %v763_v16 = vpop.eup %762 }
 0x12a   :  { %155 = vst [vmem:[#allocation8] sm:$0xff] %v763_v16  ;;  %v158_v17 = vpack.c.bf16 %v763_v16, %v763_v16 }
 0x12c   :  { %621 = vmatmul.mubr.bf16.vlgmr.msra.gmra.mrb[0].mxu1 %v158_v17 }
 0x12d   :  { %645 = vmatpush3.bf16.msra.mxu1 %v908_v1  ;;  %660 = vmatprep.mubr.msk.bf16.mxu1 %vm857_vm0, %v856_v0 }
 0x12e   :  { %646 = vmatprep.subr.bf16.mxu1 %v856_v0 }
 0x131   :  { %647 = vmatpush3.bf16.msra.mxu1 %v911_v2 }
 0x132   :  { %648 = vmatprep.subr.bf16.mxu1 %v856_v0 }
 0x135   :  { %649 = vmatpush3.bf16.msra.mxu1 %v917_v3 }
 0x136   :  { %650 = vmatprep.subr.bf16.mxu1 %v856_v0 }
 0x139   :  { %651 = vmatpush3.bf16.msra.mxu1 %v923_v4 }
 0x13a   :  { %652 = vmatprep.subr.bf16.mxu1 %v856_v0 }
 0x13d   :  { %653 = vmatpush3.bf16.msra.mxu1 %v929_v5 }
 0x13e   :  { %654 = vmatprep.subr.bf16.mxu1 %v856_v0 }
 0x141   :  { %655 = vmatpush3.bf16.msra.mxu1 %v935_v6 }
 0x142   :  { %656 = vmatprep.subr.bf16.mxu1 %v856_v0 }
 0x145   :  { %657 = vmatpush3.bf16.msra.mxu1 %v941_v7 }
 0x146   :  { %658 = vmatprep.subr.bf16.mxu1 %v856_v0 }
 0x149   :  { %659 = vmatpush3.bf16.msra.mxu1 %v947_v8 }
 0x14a   :  { %684 = vmatprep.subr.bf16.mxu1 %v856_v0 }
 0x1ff   :  { %v193_v19 = vpop.f32.mrb[0].mxu1 }
 0x200   :  { %v199_v20 = vadd.f32 %v193_v19, %v157_v18  ;;  %v622_v21 = vpop.f32.mrb[1].mxu1 }
 0x201   :  { %v196_v22 = vpop.f32.mrb[2].mxu1 }
 0x202   :  { %764 = vtanh.f32 %v199_v20  ;;  %v623_v23 = vpop.f32.mrb[3].mxu1 }
 0x20c   :  { %v765_v24 = vpop.eup %764 }
 0x20d   :  { %202 = vst [vmem:[#allocation8 + $0x8] sm:$0xff] %v765_v24  ;;  %v205_v25 = vpack.c.bf16 %v765_v24, %v765_v24 }
 0x20f   :  { %641 = vmatmul.mubr.bf16.vlgmr.msra.gmra.mrb[4].mxu0 %v205_v25 }
 0x210   :  { %665 = vmatpush3.bf16.msra.mxu0 %v908_v1  ;;  %680 = vmatprep.mubr.msk.bf16.mxu0 %vm857_vm0, %v856_v0 }
 0x211   :  { %666 = vmatprep.subr.bf16.mxu0 %v856_v0 }
 0x214   :  { %667 = vmatpush3.bf16.msra.mxu0 %v911_v2 }
 0x215   :  { %668 = vmatprep.subr.bf16.mxu0 %v856_v0 }
 0x218   :  { %669 = vmatpush3.bf16.msra.mxu0 %v917_v3 }
 0x219   :  { %670 = vmatprep.subr.bf16.mxu0 %v856_v0 }
 0x21c   :  { %671 = vmatpush3.bf16.msra.mxu0 %v923_v4 }
 0x21d   :  { %672 = vmatprep.subr.bf16.mxu0 %v856_v0 }
 0x220   :  { %673 = vmatpush3.bf16.msra.mxu0 %v929_v5 }
 0x221   :  { %674 = vmatprep.subr.bf16.mxu0 %v856_v0 }
 0x224   :  { %675 = vmatpush3.bf16.msra.mxu0 %v935_v6 }
 0x225   :  { %676 = vmatprep.subr.bf16.mxu0 %v856_v0 }
 0x228   :  { %677 = vmatpush3.bf16.msra.mxu0 %v941_v7 }
 0x229   :  { %678 = vmatprep.subr.bf16.mxu0 %v856_v0 }
 0x22c   :  { %679 = vmatpush3.bf16.msra.mxu0 %v947_v8 }
 0x22d   :  { %704 = vmatprep.subr.bf16.mxu0 %v856_v0 }
 0x2e2   :  { %v240_v27 = vpop.f32.mrb[4].mxu0 }
 0x2e3   :  { %v246_v28 = vadd.f32 %v240_v27, %v204_v26  ;;  %v642_v29 = vpop.f32.mrb[5].mxu0 }
 0x2e4   :  { %v243_v30 = vpop.f32.mrb[6].mxu0 }
 0x2e5   :  { %766 = vtanh.f32 %v246_v28  ;;  %v643_v31 = vpop.f32.mrb[7].mxu0 }
 0x2ef   :  { %v767_v32 = vpop.eup %766 }
 0x2f0   :  { %249 = vst [vmem:[#allocation8 + $0x10] sm:$0xff] %v767_v32  ;;  %v252_v33 = vpack.c.bf16 %v767_v32, %v767_v32 }
 0x2f2   :  { %661 = vmatmul.mubr.bf16.vlgmr.msra.gmra.mrb[4].mxu1 %v252_v33 }
 0x2f3   :  { %685 = vmatpush3.bf16.msra.mxu1 %v908_v1  ;;  %700 = vmatprep.mubr.msk.bf16.mxu1 %vm857_vm0, %v856_v0 }
 0x2f4   :  { %686 = vmatprep.subr.bf16.mxu1 %v856_v0 }
 0x2f7   :  { %687 = vmatpush3.bf16.msra.mxu1 %v911_v2 }
 0x2f8   :  { %688 = vmatprep.subr.bf16.mxu1 %v856_v0 }
 0x2fb   :  { %689 = vmatpush3.bf16.msra.mxu1 %v917_v3 }
 0x2fc   :  { %690 = vmatprep.subr.bf16.mxu1 %v856_v0 }
 0x2ff   :  { %691 = vmatpush3.bf16.msra.mxu1 %v923_v4 }
 0x300   :  { %692 = vmatprep.subr.bf16.mxu1 %v856_v0 }
 0x303   :  { %693 = vmatpush3.bf16.msra.mxu1 %v929_v5 }
 0x304   :  { %694 = vmatprep.subr.bf16.mxu1 %v856_v0 }
 0x307   :  { %695 = vmatpush3.bf16.msra.mxu1 %v935_v6 }
 0x308   :  { %696 = vmatprep.subr.bf16.mxu1 %v856_v0 }
 0x30b   :  { %697 = vmatpush3.bf16.msra.mxu1 %v941_v7 }
 0x30c   :  { %698 = vmatprep.subr.bf16.mxu1 %v856_v0 }
 0x30f   :  { %699 = vmatpush3.bf16.msra.mxu1 %v947_v8 }
 0x310   :  { %724 = vmatprep.subr.bf16.mxu1 %v856_v0 }
 0x3c5   :  { %v287_v35 = vpop.f32.mrb[4].mxu1 }
 0x3c6   :  { %v293_v36 = vadd.f32 %v287_v35, %v251_v34  ;;  %v662_v37 = vpop.f32.mrb[5].mxu1 }
 0x3c7   :  { %v290_v38 = vpop.f32.mrb[6].mxu1 }
 0x3c8   :  { %768 = vtanh.f32 %v293_v36  ;;  %v663_v39 = vpop.f32.mrb[7].mxu1 }
 0x3d2   :  { %v769_v40 = vpop.eup %768 }
 0x3d3   :  { %296 = vst [vmem:[#allocation8 + $0x18] sm:$0xff] %v769_v40  ;;  %v299_v41 = vpack.c.bf16 %v769_v40, %v769_v40 }
 0x3d5   :  { %681 = vmatmul.mubr.bf16.vlgmr.msra.gmra.mrb[8].mxu0 %v299_v41 }
 0x3d6   :  { %705 = vmatpush3.bf16.msra.mxu0 %v908_v1  ;;  %720 = vmatprep.mubr.msk.bf16.mxu0 %vm857_vm0, %v856_v0 }
 0x3d7   :  { %706 = vmatprep.subr.bf16.mxu0 %v856_v0 }
 0x3da   :  { %707 = vmatpush3.bf16.msra.mxu0 %v911_v2 }
 0x3db   :  { %708 = vmatprep.subr.bf16.mxu0 %v856_v0 }
 0x3de   :  { %709 = vmatpush3.bf16.msra.mxu0 %v917_v3 }
 0x3df   :  { %710 = vmatprep.subr.bf16.mxu0 %v856_v0 }
 0x3e2   :  { %711 = vmatpush3.bf16.msra.mxu0 %v923_v4 }
 0x3e3   :  { %712 = vmatprep.subr.bf16.mxu0 %v856_v0 }
 0x3e6   :  { %713 = vmatpush3.bf16.msra.mxu0 %v929_v5 }
 0x3e7   :  { %714 = vmatprep.subr.bf16.mxu0 %v856_v0 }
 0x3ea   :  { %715 = vmatpush3.bf16.msra.mxu0 %v935_v6 }
 0x3eb   :  { %716 = vmatprep.subr.bf16.mxu0 %v856_v0 }
 0x3ee   :  { %717 = vmatpush3.bf16.msra.mxu0 %v941_v7 }
 0x3ef   :  { %718 = vmatprep.subr.bf16.mxu0 %v856_v0 }
 0x3f2   :  { %719 = vmatpush3.bf16.msra.mxu0 %v947_v8 }
 0x4a8   :  { %v334_v43 = vpop.f32.mrb[8].mxu0 }
 0x4a9   :  { %v340_v44 = vadd.f32 %v334_v43, %v298_v42  ;;  %v682_v45 = vpop.f32.mrb[9].mxu0 }
 0x4aa   :  { %v337_v46 = vpop.f32.mrb[10].mxu0 }
 0x4ab   :  { %770 = vtanh.f32 %v340_v44  ;;  %v683_v47 = vpop.f32.mrb[11].mxu0 }
 0x4b5   :  { %v771_v48 = vpop.eup %770 }
 0x4b6   :  { %343 = vst [vmem:[#allocation8 + $0x20] sm:$0xff] %v771_v48  ;;  %v346_v49 = vpack.c.bf16 %v771_v48, %v771_v48 }
 0x4b8   :  { %701 = vmatmul.mubr.bf16.vlgmr.msra.gmra.mrb[8].mxu1 %v346_v49 }
 0x4b9   :  { %725 = vmatpush3.bf16.msra.mxu1 %v908_v1  ;;  %740 = vmatprep.mubr.msk.bf16.mxu1 %vm857_vm0, %v856_v0 }
 0x4ba   :  { %726 = vmatprep.subr.bf16.mxu1 %v856_v0 }
 0x4bd   :  { %727 = vmatpush3.bf16.msra.mxu1 %v911_v2  ;;  %v439_v2 = vld [vmem:[#allocation3 + $0x38] sm:$0xff] }
 0x4be   :  { %728 = vmatprep.subr.bf16.mxu1 %v856_v0 }
 0x4c1   :  { %729 = vmatpush3.bf16.msra.mxu1 %v917_v3 }
 0x4c2   :  { %730 = vmatprep.subr.bf16.mxu1 %v856_v0 }
 0x4c5   :  { %731 = vmatpush3.bf16.msra.mxu1 %v923_v4 }
 0x4c6   :  { %732 = vmatprep.subr.bf16.mxu1 %v856_v0 }
 0x4c9   :  { %733 = vmatpush3.bf16.msra.mxu1 %v929_v5 }
 0x4ca   :  { %734 = vmatprep.subr.bf16.mxu1 %v856_v0 }
 0x4cd   :  { %735 = vmatpush3.bf16.msra.mxu1 %v935_v6 }
 0x4ce   :  { %736 = vmatprep.subr.bf16.mxu1 %v856_v0 }
 0x4d1   :  { %737 = vmatpush3.bf16.msra.mxu1 %v941_v7 }
 0x4d2   :  { %738 = vmatprep.subr.bf16.mxu1 %v856_v0 }
 0x4d5   :  { %739 = vmatpush3.bf16.msra.mxu1 %v947_v8 }
 0x58b   :  { %v381_v51 = vpop.f32.mrb[8].mxu1 }
 0x58c   :  { %v387_v52 = vadd.f32 %v381_v51, %v345_v50  ;;  %v702_v53 = vpop.f32.mrb[9].mxu1 }
 0x58d   :  { %v384_v54 = vpop.f32.mrb[10].mxu1 }
 0x58e   :  { %772 = vtanh.f32 %v387_v52  ;;  %v703_v55 = vpop.f32.mrb[11].mxu1 }
 0x598   :  { %v773_v56 = vpop.eup %772 }
 0x599   :  { %390 = vst [vmem:[#allocation8 + $0x28] sm:$0xff] %v773_v56  ;;  %v393_v57 = vpack.c.bf16 %v773_v56, %v773_v56 }
 0x59b   :  { %721 = vmatmul.mubr.bf16.vlgmr.msra.gmra.mrb[12].mxu0 %v393_v57 }
 0x66e   :  { %v428_v59 = vpop.f32.mrb[12].mxu0 }
 0x66f   :  { %v434_v60 = vadd.f32 %v428_v59, %v392_v58  ;;  %v722_v61 = vpop.f32.mrb[13].mxu0 }
 0x670   :  { %v431_v62 = vpop.f32.mrb[14].mxu0 }
 0x671   :  { %774 = vtanh.f32 %v434_v60  ;;  %v723_v63 = vpop.f32.mrb[15].mxu0 }
 0x67b   :  { %v775_v0 = vpop.eup %774 }
 0x67c   :  { %437 = vst [vmem:[#allocation8 + $0x30] sm:$0xff] %v775_v0  ;;  %v440_v1 = vpack.c.bf16 %v775_v0, %v775_v0 }
 0x67e   :  { %741 = vmatmul.mubr.bf16.vlgmr.msra.gmra.mrb[12].mxu1 %v440_v1 }
 0x751   :  { %v475_v3 = vpop.f32.mrb[12].mxu1 }
 0x752   :  { %v481_v4 = vadd.f32 %v475_v3, %v439_v2  ;;  %v742_v5 = vpop.f32.mrb[13].mxu1 }
 0x753   :  { %v478_v6 = vpop.f32.mrb[14].mxu1 }
 0x754   :  { %776 = vtanh.f32 %v481_v4  ;;  %v743_v7 = vpop.f32.mrb[15].mxu1 }
 0x75e   :  { %v777_v8 = vpop.eup %776 }
 0x75f   :  { %484 = vst [vmem:[#allocation8 + $0x38] sm:$0xff] %v777_v8 }
 0x760   :  { %833 = shalt.err (!%p830_p6)
}
 0x761   :  { %s834_s12 = scalar_lea.hbm %s1079_s2, 1024 }
 0x762   :  { %p835_p7 = scmp.ne.s32.totalorder %s1079_s2, %s834_s12  ;;  %p838_p8 = scmp.lt.u32.totalorder %s834_s12, %s1079_s2 }
 0x764   :  { %p840_p9 = pnand %p838_p8, %p835_p7 }
 0x766   :  { %843 = shalt.err (!%p840_p9)
}
 0x767   :  { %497 = dma.vmem_to_hbm [thread:$0]  %s492_s8, 1024, %s1079_s2, [#allocation5], %s851_s19, %s851_s19, %s852_s20  }
 0x768   :  { %848 = dma.done.wait [#allocation5], 1024  }
 0x769   :  { %849 = vsyncadd [#allocation5], 4294966272 }
 0x76a   :  { %501 = vsyncpa [#allocation4], 1 }
 0x76b   :  { %502 = vsyncpa [#allocation7], 1 }
 0x76c   :  { %503 = vsyncpa [#allocation5], 1 }

</bundles_post_ra>
